<compile_context>
chip_gen: v6e
topology: v6e:2x2x1
jax: 0.10.0
libtpu: 0.0.40
codegen_flags: <defaults>
</compile_context>

<pallas_src>
import functools

import jax
import jax.numpy as jnp
from jax.experimental import pallas as pl
from jax.experimental.pallas import tpu as pltpu


def _make_divisible(ch, divisor=8, min_ch=None):
    if min_ch is None:
        min_ch = divisor
    new_ch = max(min_ch, int(ch + divisor / 2) // divisor * divisor)
    if new_ch < 0.9 * ch:
        new_ch += divisor
    return new_ch


def _vmem_budget():
    """Returns (target input-tile bytes, scoped VMEM limit) per generation."""
    try:
        vmem_bytes = int(getattr(pltpu.get_tpu_info(), "vmem_capacity_bytes"))
    except Exception:
        vmem_bytes = 64 << 20                 # conservative (v7x-sized)
    if vmem_bytes >= (128 << 20):             # v5e / v6e: 128 MiB physical
        return (4 << 20), (64 << 20)
    return (2 << 20), (32 << 20)              # v7x (64 MiB physical) / unknown


# --------------------------- fused single-pass kernel ------------------------

def _se_kernel(x_ref, w1t_ref, b1_ref, w2t_ref, b2_ref, o_ref, *, inv_hw):
    # x_ref / o_ref : (bn, C, HW)   (true, un-padded spatial size)
    # w1t: (C, Csq)  b1: (1, Csq)   w2t: (Csq, C)  b2: (1, C)

    # adaptive_avg_pool2d((1,1)) == mean over spatial.  The cast is fused into
    # the reduction; no full-tile f32 copy is kept live across the body.
    mean = jnp.sum(x_ref[...].astype(jnp.float32), axis=2) * inv_hw     # (bn, C)

    # fc1 (1x1 conv) + relu — batched over bn so the MXU has a real M dim.
    s = jnp.dot(mean, w1t_ref[...], preferred_element_type=jnp.float32)
    s = jnp.maximum(s + b1_ref[...], 0.0)                               # (bn, Csq)

    # fc2 (1x1 conv) + hardsigmoid ( relu6(x+3)/6 )
    s = jnp.dot(s, w2t_ref[...], preferred_element_type=jnp.float32)
    s = jnp.clip(s + b2_ref[...] + 3.0, 0.0, 6.0) * (1.0 / 6.0)         # (bn, C)

    # scale * x — multiply in the input dtype; re-read the VMEM-resident tile.
    o_ref[...] = s.astype(o_ref.dtype)[:, :, None] * x_ref[...]


def _se_fused(x_flat, w1t, b1_row, w2t, b2_row, *, bn, vmem_limit):
    N, C, HW = x_flat.shape
    Csq = w1t.shape[1]
    db = x_flat.dtype.itemsize

    cost = pl.CostEstimate(
        flops=2 * N * (C * Csq + Csq * C) + 2 * N * C * HW,
        transcendentals=0,
        bytes_accessed=2 * N * C * HW * db + (2 * C * Csq + C + Csq) * db,
    )

    return pl.pallas_call(
        functools.partial(_se_kernel, inv_hw=1.0 / HW),
        out_shape=jax.ShapeDtypeStruct((N, C, HW), x_flat.dtype),
        grid_spec=pltpu.PrefetchScalarGridSpec(
            num_scalar_prefetch=0,
            grid=(pl.cdiv(N, bn),),
            in_specs=[
                pl.BlockSpec((bn, C, HW), lambda n: (n, 0, 0)),
                pl.BlockSpec((C, Csq), lambda n: (0, 0)),
                pl.BlockSpec((1, Csq), lambda n: (0, 0)),
                pl.BlockSpec((Csq, C), lambda n: (0, 0)),
                pl.BlockSpec((1, C), lambda n: (0, 0)),
            ],
            out_specs=pl.BlockSpec((bn, C, HW), lambda n: (n, 0, 0)),
        ),
        compiler_params=pltpu.CompilerParams(
            dimension_semantics=("parallel",),
            vmem_limit_bytes=vmem_limit,
        ),
        cost_estimate=cost,
    )(x_flat, w1t, b1_row, w2t, b2_row)


# ----------------- two-pass fallback (single image > VMEM budget) ------------

def _se_scale_kernel(x_ref, w1t_ref, b1_ref, w2t_ref, b2_ref, s_ref, acc_ref,
                     *, inv_hw, hw, hw_tile, need_mask):
    # grid = (N, n_hw); x_ref: (1, C, hw_tile); s_ref: (1, C, 1); acc: (1, C)
    j = pl.program_id(1)

    @pl.when(j == 0)
    def _():
        acc_ref[...] = jnp.zeros_like(acc_ref)

    xf = x_ref[...].astype(jnp.float32)                         # (1, C, hw_tile)
    if need_mask:
        pos = jax.lax.broadcasted_iota(jnp.int32, xf.shape, 2) + j * hw_tile
        xf = jnp.where(pos < hw, xf, 0.0)
    acc_ref[...] += jnp.sum(xf, axis=2)                         # (1, C)

    @pl.when(j == pl.num_programs(1) - 1)
    def _():
        mean = acc_ref[...] * inv_hw                            # (1, C)
        s = jnp.dot(mean, w1t_ref[...], preferred_element_type=jnp.float32)
        s = jnp.maximum(s + b1_ref[...], 0.0)
        s = jnp.dot(s, w2t_ref[...], preferred_element_type=jnp.float32)
        s = jnp.clip(s + b2_ref[...] + 3.0, 0.0, 6.0) * (1.0 / 6.0)
        s_ref[...] = s[:, :, None].astype(s_ref.dtype)          # (1, C, 1)


def _se_apply_kernel(s_ref, x_ref, o_ref):
    # s_ref: (1, C, 1) f32; x_ref / o_ref: (1, C, hw_tile)
    o_ref[...] = s_ref[...].astype(o_ref.dtype) * x_ref[...]


def _se_split(x_flat, w1t, b1_row, w2t, b2_row, *, hw_tile, vmem_limit):
    N, C, HW = x_flat.shape
    Csq = w1t.shape[1]
    n_hw = pl.cdiv(HW, hw_tile)
    need_mask = (HW % hw_tile) != 0 and hw_tile != HW

    scale_kernel = functools.partial(
        _se_scale_kernel, inv_hw=1.0 / HW, hw=HW, hw_tile=hw_tile,
        need_mask=need_mask)

    s = pl.pallas_call(
        scale_kernel,
        out_shape=jax.ShapeDtypeStruct((N, C, 1), jnp.float32),
        grid_spec=pltpu.PrefetchScalarGridSpec(
            num_scalar_prefetch=0,
            grid=(N, n_hw),
            in_specs=[
                pl.BlockSpec((1, C, hw_tile), lambda n, j: (n, 0, j)),
                pl.BlockSpec((C, Csq), lambda n, j: (0, 0)),
                pl.BlockSpec((1, Csq), lambda n, j: (0, 0)),
                pl.BlockSpec((Csq, C), lambda n, j: (0, 0)),
                pl.BlockSpec((1, C), lambda n, j: (0, 0)),
            ],
            out_specs=pl.BlockSpec((1, C, 1), lambda n, j: (n, 0, 0)),
            scratch_shapes=[pltpu.VMEM((1, C), jnp.float32)],
        ),
        compiler_params=pltpu.CompilerParams(
            dimension_semantics=("parallel", "arbitrary"),
            vmem_limit_bytes=vmem_limit,
        ),
    )(x_flat, w1t, b1_row, w2t, b2_row)

    out = pl.pallas_call(
        _se_apply_kernel,
        out_shape=jax.ShapeDtypeStruct((N, C, HW), x_flat.dtype),
        grid_spec=pltpu.PrefetchScalarGridSpec(
            num_scalar_prefetch=0,
            grid=(N, n_hw),
            in_specs=[
                pl.BlockSpec((1, C, 1), lambda n, j: (n, 0, 0)),
                pl.BlockSpec((1, C, hw_tile), lambda n, j: (n, 0, j)),
            ],
            out_specs=pl.BlockSpec((1, C, hw_tile), lambda n, j: (n, 0, j)),
        ),
        compiler_params=pltpu.CompilerParams(
            dimension_semantics=("parallel", "parallel"),
            vmem_limit_bytes=vmem_limit,
        ),
    )(s, x_flat)
    return out


# --------------------------------- wrapper -----------------------------------

def squeeze_excitation(x, w1, b1, w2, b2, *, _force_split=False,
                       _force_bn=None, _force_hw_tile=None):
    """x: (N, C, H, W); w1: (Csq, C); b1: (Csq,); w2: (C, Csq); b2: (C,).
    (1x1 conv weights squeezed to 2-D.)"""
    N, C, H, W = x.shape
    HW = H * W
    Csq = w1.shape[0]
    db = x.dtype.itemsize

    target_tile, vmem_limit = _vmem_budget()

    x_flat = x.reshape(N, C, HW)
    w1t = jnp.transpose(w1)          # (C, Csq)
    w2t = jnp.transpose(w2)          # (Csq, C)
    b1_row = b1.reshape(1, Csq)      # lane-dense bias rows
    b2_row = b2.reshape(1, C)

    per_n = C * HW * db              # bytes of one image

    # Batch tile: target-sized blocks, capped so the double-buffered
    # (input + output) footprint stays inside the scoped VMEM limit, and so
    # there are >= ~4 grid steps when possible (DMA overlap / v7x megacore).
    bn = max(1, target_tile // per_n)
    bn = min(bn, max(1, (vmem_limit // 2) // (4 * per_n)))
    bn = min(bn, max(1, N // 4))
    bn = min(bn, N)
    if _force_bn is not None:
        bn = max(1, min(_force_bn, N))

    # Guard: if even one image blows the double-buffered budget, split HW.
    single_too_big = 4 * per_n > (vmem_limit // 2)
    if _force_split or single_too_big:
        lane = 128
        hw_tile = max(lane, (target_tile // (C * db)) // lane * lane)
        cap = max(lane, ((vmem_limit // 2) // (4 * C * db)) // lane * lane)
        hw_tile = min(hw_tile, cap)
        if _force_hw_tile is not None:
            hw_tile = _force_hw_tile
        if hw_tile >= HW:
            hw_tile = HW             # full-dim block, exempt from lane rule
        out_flat = _se_split(x_flat, w1t, b1_row, w2t, b2_row,
                             hw_tile=hw_tile, vmem_limit=vmem_limit)
    else:
        out_flat = _se_fused(x_flat, w1t, b1_row, w2t, b2_row,
                             bn=bn, vmem_limit=vmem_limit)

    return out_flat.reshape(N, C, H, W)


def _reference(x, w1, b1, w2, b2):
    mean = jnp.mean(x.astype(jnp.float32), axis=(2, 3), keepdims=True)
    s = jnp.einsum('oc,ncij->noij', w1, mean) + b1[None, :, None, None]
    s = jax.nn.relu(s)
    s = jnp.einsum('oc,ncij->noij', w2, s) + b2[None, :, None, None]
    s = jnp.clip(s + 3.0, 0.0, 6.0) / 6.0
    return (s * x).astype(x.dtype)


if __name__ == "__main__":
    key = jax.random.PRNGKey(0)
    k = jax.random.split(key, 8)

    # Shapes consistent with the module: input_c=16 -> squeeze_c=8.
    C = 16
    Csq = _make_divisible(C // 4, 8)  # 8

    w1 = jax.random.normal(k[0], (Csq, C), dtype=jnp.float32) * 0.1
    b1 = jax.random.normal(k[1], (Csq,), dtype=jnp.float32) * 0.1
    w2 = jax.random.normal(k[2], (C, Csq), dtype=jnp.float32) * 0.1
    b2 = jax.random.normal(k[3], (C,), dtype=jnp.float32) * 0.1

    # 1) Default fused single-pass path.
    x1 = jax.random.normal(k[4], (2, C, 16, 16), dtype=jnp.float32)
    o1 = jax.block_until_ready(squeeze_excitation(x1, w1, b1, w2, b2))
    assert jnp.allclose(o1, _reference(x1, w1, b1, w2, b2), atol=1e-5, rtol=1e-5)

    # 2) Fused path with a partial (masked) trailing batch block.
    x2 = jax.random.normal(k[5], (3, C, 16, 16), dtype=jnp.float32)
    o2 = jax.block_until_ready(
        squeeze_excitation(x2, w1, b1, w2, b2, _force_bn=2))
    assert jnp.allclose(o2, _reference(x2, w1, b1, w2, b2), atol=1e-5, rtol=1e-5)

    # 3) Two-pass spatial-split fallback with masked partial spatial tile
    #    (HW = 400 = 3*128 + 16), exercising the large-image VMEM guard.
    x3 = jax.random.normal(k[6], (2, C, 20, 20), dtype=jnp.float32)
    o3 = jax.block_until_ready(
        squeeze_excitation(x3, w1, b1, w2, b2,
                           _force_split=True, _force_hw_tile=128))
    assert jnp.allclose(o3, _reference(x3, w1, b1, w2, b2), atol=1e-5, rtol=1e-5)

    print("KERNEL_OK")
</pallas_src>

<mosaic_0001>
module attributes {stable_mosaic.version = 11 : i64} {
  func.func @_se_kernel(%arg0: i32, %arg1: memref<1x16x256xf32, #tpu.memory_space<vmem>>, %arg2: memref<16x8xf32, #tpu.memory_space<vmem>>, %arg3: memref<1x8xf32, #tpu.memory_space<vmem>>, %arg4: memref<8x16xf32, #tpu.memory_space<vmem>>, %arg5: memref<1x16xf32, #tpu.memory_space<vmem>>, %arg6: memref<1x16x256xf32, #tpu.memory_space<vmem>>) attributes {dimension_semantics = [#tpu.dimension_semantics<parallel>], iteration_bounds = array<i64: 2>, scalar_prefetch = 0 : i64, scratch_operands = 0 : i64, tpu.core_type = #tpu.core_type<tc>, window_params = [{transform_indices = @transform_0, window_bounds = array<i64: 1, 16, 256>}, {pipeline_mode = #tpu.pipeline_mode<synchronous>, transform_indices = @transform_1, window_bounds = array<i64: 16, 8>}, {pipeline_mode = #tpu.pipeline_mode<synchronous>, transform_indices = @transform_2, window_bounds = array<i64: 1, 8>}, {pipeline_mode = #tpu.pipeline_mode<synchronous>, transform_indices = @transform_3, window_bounds = array<i64: 8, 16>}, {pipeline_mode = #tpu.pipeline_mode<synchronous>, transform_indices = @transform_4, window_bounds = array<i64: 1, 16>}, {transform_indices = @transform_5, window_bounds = array<i64: 1, 16, 256>}]} {
    %c0 = arith.constant 0 : index
    %c0_0 = arith.constant 0 : index
    %c0_1 = arith.constant 0 : index
    %0 = vector.load %arg1[%c0, %c0_0, %c0_1] : memref<1x16x256xf32, #tpu.memory_space<vmem>>, vector<1x16x256xf32>
    %cst = arith.constant dense<0.000000e+00> : vector<1x16xf32>
    %1 = vector.multi_reduction <add>, %0, %cst [2] : vector<1x16x256xf32> to vector<1x16xf32>
    %cst_2 = arith.constant 3.906250e-03 : f32
    %2 = vector.broadcast %cst_2 : f32 to vector<1x16xf32>
    %3 = arith.mulf %1, %2 : vector<1x16xf32>
    %c0_3 = arith.constant 0 : index
    %c0_4 = arith.constant 0 : index
    %4 = vector.load %arg2[%c0_3, %c0_4] : memref<16x8xf32, #tpu.memory_space<vmem>>, vector<16x8xf32>
    %cst_5 = arith.constant dense<0.000000e+00> : vector<1x8xf32>
    %5 = tpu.matmul %3, %4, %cst_5 {dimension_numbers = #tpu.dot_dimension_numbers<[1], [0], [0], [1], [0, 0, 1, 1], [], []>} : vector<1x16xf32>, vector<16x8xf32>, vector<1x8xf32> -> vector<1x8xf32>
    %c0_6 = arith.constant 0 : index
    %c0_7 = arith.constant 0 : index
    %6 = vector.load %arg3[%c0_6, %c0_7] : memref<1x8xf32, #tpu.memory_space<vmem>>, vector<1x8xf32>
    %7 = arith.addf %5, %6 : vector<1x8xf32>
    %cst_8 = arith.constant 0.000000e+00 : f32
    %8 = vector.broadcast %cst_8 : f32 to vector<1x8xf32>
    %9 = arith.maximumf %7, %8 : vector<1x8xf32>
    %c0_9 = arith.constant 0 : index
    %c0_10 = arith.constant 0 : index
    %10 = vector.load %arg4[%c0_9, %c0_10] : memref<8x16xf32, #tpu.memory_space<vmem>>, vector<8x16xf32>
    %cst_11 = arith.constant dense<0.000000e+00> : vector<1x16xf32>
    %11 = tpu.matmul %9, %10, %cst_11 {dimension_numbers = #tpu.dot_dimension_numbers<[1], [0], [0], [1], [0, 0, 1, 1], [], []>} : vector<1x8xf32>, vector<8x16xf32>, vector<1x16xf32> -> vector<1x16xf32>
    %c0_12 = arith.constant 0 : index
    %c0_13 = arith.constant 0 : index
    %12 = vector.load %arg5[%c0_12, %c0_13] : memref<1x16xf32, #tpu.memory_space<vmem>>, vector<1x16xf32>
    %13 = arith.addf %11, %12 : vector<1x16xf32>
    %cst_14 = arith.constant 3.000000e+00 : f32
    %14 = vector.broadcast %cst_14 : f32 to vector<1x16xf32>
    %15 = arith.addf %13, %14 : vector<1x16xf32>
    %cst_15 = arith.constant 0.000000e+00 : f32
    %cst_16 = arith.constant 6.000000e+00 : f32
    %16 = vector.broadcast %cst_15 : f32 to vector<1x16xf32>
    %17 = arith.maximumf %16, %15 : vector<1x16xf32>
    %18 = vector.broadcast %cst_16 : f32 to vector<1x16xf32>
    %19 = arith.minimumf %18, %17 : vector<1x16xf32>
    %cst_17 = arith.constant 0.166666672 : f32
    %20 = vector.broadcast %cst_17 : f32 to vector<1x16xf32>
    %21 = arith.mulf %19, %20 : vector<1x16xf32>
    %22 = vector.shape_cast %21 : vector<1x16xf32> to vector<1x16x1xf32>
    %c0_18 = arith.constant 0 : index
    %c0_19 = arith.constant 0 : index
    %c0_20 = arith.constant 0 : index
    %23 = vector.load %arg1[%c0_18, %c0_19, %c0_20] : memref<1x16x256xf32, #tpu.memory_space<vmem>>, vector<1x16x256xf32>
    %24 = vector.broadcast %22 : vector<1x16x1xf32> to vector<1x16x256xf32>
    %25 = arith.mulf %24, %23 : vector<1x16x256xf32>
    %c0_21 = arith.constant 0 : index
    %c0_22 = arith.constant 0 : index
    %c0_23 = arith.constant 0 : index
    %26 = vector.load %arg6[%c0_21, %c0_22, %c0_23] : memref<1x16x256xf32, #tpu.memory_space<vmem>>, vector<1x16x256xf32>
    tpu.vector_store %arg6[%c0_21, %c0_22, %c0_23], %25 {strides = array<i32>} : memref<1x16x256xf32, #tpu.memory_space<vmem>>, vector<1x16x256xf32>,
    return
  }
  func.func @transform_0(%arg0: i32) -> (i32, i32, i32) {
    %c0_i32 = arith.constant 0 : i32
    %c0_i32_0 = arith.constant 0 : i32
    %c0_i32_1 = arith.constant 0 : i32
    return %arg0, %c0_i32, %c0_i32_0 : i32, i32, i32
  }
  func.func @transform_1(%arg0: i32) -> (i32, i32) {
    %c0_i32 = arith.constant 0 : i32
    %c0_i32_0 = arith.constant 0 : i32
    %c0_i32_1 = arith.constant 0 : i32
    return %c0_i32, %c0_i32_0 : i32, i32
  }
  func.func @transform_2(%arg0: i32) -> (i32, i32) {
    %c0_i32 = arith.constant 0 : i32
    %c0_i32_0 = arith.constant 0 : i32
    %c0_i32_1 = arith.constant 0 : i32
    return %c0_i32, %c0_i32_0 : i32, i32
  }
  func.func @transform_3(%arg0: i32) -> (i32, i32) {
    %c0_i32 = arith.constant 0 : i32
    %c0_i32_0 = arith.constant 0 : i32
    %c0_i32_1 = arith.constant 0 : i32
    return %c0_i32, %c0_i32_0 : i32, i32
  }
  func.func @transform_4(%arg0: i32) -> (i32, i32) {
    %c0_i32 = arith.constant 0 : i32
    %c0_i32_0 = arith.constant 0 : i32
    %c0_i32_1 = arith.constant 0 : i32
    return %c0_i32, %c0_i32_0 : i32, i32
  }
  func.func @transform_5(%arg0: i32) -> (i32, i32, i32) {
    %c0_i32 = arith.constant 0 : i32
    %c0_i32_0 = arith.constant 0 : i32
    %c0_i32_1 = arith.constant 0 : i32
    return %arg0, %c0_i32, %c0_i32_0 : i32, i32, i32
  }
}

</mosaic_0001>

<bundles_post_ra>
// kernel: tpu_custom_call.1
= control target key start
LH: loop header
LB: loop body
LE: loop exit
PB: predicated region body
PF: predicated region fallthrough
CT: control target
= control target key end

     0   :  { %10 = vsyncpa [#allocation3], 0  ;;  %s933_s0 = inlined_call_operand.hbm [shape: f32[2,16,256], index: 0, kind: input, shape index: {}]   ;;  %s934_s1 = inlined_call_operand.vmem [shape: f32[16,8], index: 1, kind: input, shape index: {}]   ;;  %s935_s2 = inlined_call_operand.vmem [shape: f32[1,8], index: 2, kind: input, shape index: {}]   ;;  %s936_s3 = inlined_call_operand.vmem [shape: f32[8,16], index: 3, kind: input, shape index: {}]   ;;  %s937_s4 = inlined_call_operand.vmem [shape: f32[1,16], index: 4, kind: input, shape index: {}]   ;;  %s938_s5 = inlined_call_operand.hbm [shape: f32[2,16,256], index: 5, kind: output, shape index: {}]  }
   0x1   :  { %12 = vsyncpa [#allocation3 + $0x1], 0 }
   0x2   :  { %13 = vsyncpa [#allocation4], 0 }
   0x3   :  { %15 = vsyncpa [#allocation4 + $0x1], 0  ;;  %s752_s18 = smov 0   ;;  %s754_s19 = smov 0  }
   0x4   :  { %s756_s20 = smov 0   ;;  %s758_s21 = smov 0  }
   0x5 LB: > { %s773_s22 = sadd.s32 4294967295, %s712_s21   ;;  %s533_s23 = sadd.s32 4294967294, %s712_s21   ;;  %s712_s21 = sphi %s758_s21, %s953_s21   ;;  %s708_s20 = sphi %s756_s20, %s952_s20   ;;  %s704_s19 = sphi %s754_s19, %s951_s19   ;;  %s700_s18 = sphi %s752_s18, %s950_s18  }
   0x6   : > { %s777_s24 = sadd.s32 1, %s712_s21   ;;  %s28_s25 = sadd.s32 1, %s708_s20 }
   0x7   : > { %s25_s26 = ssub.s32 %s712_s21, %s777_s24  ;;  %p35_p0 = scmp.ne.s32.totalorder %s708_s20, %s704_s19 }
   0x8   : > { %p26_p1 = scmp.eq.s32.totalorder %s25_s26, 0  ;;  %p36_p2 = scmp.eq.s32.totalorder %s712_s21, 0 }
   0x9   : > { %p41_p3 = scmp.ne.s32.totalorder %s704_s19, %s700_s18  ;;  %p42_p4 = scmp.eq.s32.totalorder %s773_s22, 0 }
   0xa   : > { %s789_s27 = scalar_select %p26_p1, %s708_s20, %s28_s25  }
   0xb   : > { %p791_p5 = por %p36_p2, %p35_p0  ;;  %p795_p6 = por %p42_p4, %p41_p3 }
   0xc   : > { %p149_p7 = scmp.eq.s32.totalorder %s773_s22, 1  ;;  %p155_p8 = scmp.eq.s32.totalorder %s533_s23, 1 }
   0xd   : > { %s942_s29 = scalar_select %p795_p6, 1, 0 }
   0xe   : > { %p580_p10 = scmp.lt.s32.totalorder %s712_s21, 2  ;;  %p802_p11 = por %p149_p7, %p35_p0 }
   0xf   : > { %p806_p12 = por %p155_p8, %p41_p3  ;;  %s187_s7 = sand.u32 1, %s708_s20  }
  0x10   : > { %s943_s30 = scalar_select %p802_p11, 1, 0 }
  0x11   : > { %s944_s6 = scalar_select %p806_p12, 1, 0 }
  0x12   : > { %s549_s8 = sshll.u32 %s712_s21, 9  ;;  %s536_s9 = sshll.u32 %s187_s7, 5 }
  0x13   : > { %s815_s12 = scalar_lea.hbm %s933_s0, %s549_s8  ;;  %s191_s13 = scalar_lea.vmem [#allocation2], %s536_s9 }
  0x14   : > { %s198_s14 = sshll.u32 %s191_s13, 4  ;;  %p819_p13 = pnand %p580_p10, %p791_p5  ;;  %s823_s14 = int_to_ptr.vmem [resolvable:$true] %s198_s14 }
  0x15   : > { %s825_s16 = scalar_lea.sflag [#allocation3], %s187_s7  ;;  %s620_s17 = scalar_lea.hbm %s815_s12, 512 }
  0x16   : > { %p621_p0 = scmp.ne.s32.totalorder %s815_s12, %s620_s17  ;;  %p622_p1 = pneg %p819_p13 }
  0x17   : > { %s625_s26 = scalar_lea.hbm %s933_s0, 1024  ;;  %p626_p4 = scmp.lt.s32.totalorder %s815_s12, %s933_s0 }
  0x18   : > { %p623_p2 = pnand %p622_p1, %p621_p0  ;;  %p627_p5 = scmp.lt.s32.totalorder %s625_s26, %s620_s17 }
  0x1a   : > { %p624_p3 = pneg %p623_p2  ;;  %p628_p7 = por %p627_p5, %p626_p4 }
  0x1c   : > { %p629_p8 = pnand %p628_p7, %p624_p3 }
  0x1e   : > { %632 = shalt.err (!%p629_p8)
}
  0x1f   : > { %s633_s7 = scalar_lea.vmem %s823_s14, 512  ;;  %s714_s9 = smov [#allocation2]  }
  0x20   : > { %p634_p10 = scmp.ne.s32.totalorder %s823_s14, %s633_s7  ;;  %s638_s10 = sshll.u32 %s714_s9, 4  ;;  %s639_s10 = int_to_ptr.vmem [resolvable:$false] %s638_s10 }
  0x21   : > { %s640_s11 = scalar_lea.vmem %s639_s10, 1024  ;;  %p641_p2 = scmp.lt.s32.totalorder %s823_s14, %s639_s10 }
  0x22   : > { %p636_p9 = pnand %p634_p10, %p622_p1  ;;  %p642_p12 = scmp.lt.s32.totalorder %s640_s11, %s633_s7 }
  0x24   : > { %p637_p0 = pneg %p636_p9  ;;  %p643_p11 = por %p642_p12, %p641_p2 }
  0x26   : > { %p644_p6 = pnand %p643_p11, %p637_p0 }
  0x28   : > { %647 = shalt.err (!%p644_p6)
}
  0x29   : > { %s715_s13 = smov 256   ;;  %s716_s17 = smov 16  }
  0x2a   : > { %575 = dma.hbm_to_vmem [thread:$0]  (!%p819_p13), %s815_s12, 512, %s823_s14, %s825_s16, %s715_s13, %s715_s13, %s716_s17  }
  0x2b   : > { %p539_p9 = scmp.ge.s32.totalorder %s712_s21, 1  ;;  %p206_p1 = scmp.lt.s32.totalorder %s712_s21, 3 }
  0x2d   : > { %p207_p3 = pnand %p539_p9, %p206_p1 }
  0x2e   : > { %s849_s23 = sand.u32 (!%p207_p3), 1, %s704_s19   ;;  %p946_p6 = scmp.ne.s32.totalorder (!%p207_p3), %s942_s29, 0 }
  0x2f   : > { %210 = sbr.rel (%p207_p3) target bundleno = 740 (0x2e4), region = 40  ;;  %s540_s25 = sshll.u32 (!%p207_p3), %s849_s23, 5 }
  0x30   : > { %s213_s26 = scalar_lea.sflag (!%p207_p3), [#allocation3], %s849_s23  ;;  %s216_s28 = scalar_lea.vmem (!%p207_p3), [#allocation2], %s540_s25 }
  0x34   : > { %691 = dma.done.wait (%p946_p6), %s213_s26, 512  }
  0x35   : > { %693 = vsyncadd (%p946_p6), %s213_s26, 4294966784  ;;  %v243_v0 = vld [vmem:[%s216_s28] sm:$0xff]  ;;  %v244_v1 = vld [vmem:[%s216_s28 + $0x8] sm:$0xff]  ;;  %v717_v6 = vmov 0.0   ;;  %vm718_vm0 = vmmov 0   ;;  %v260_v9 = vlaneseq  ;;  %vm271_vm1 = vcmask 130112  }
  0x36   : > { %v859_v2 = vld [vmem:[%s216_s28 + $0x10] sm:$0xff]  ;;  %v247_v3 = vadd.f32 %v244_v1, %v243_v0  ;;  %v861_v4 = vld [vmem:[%s216_s28 + $0x18] sm:$0xff]  ;;  %556 = vmatprep.subr.mxu0 %v717_v6  ;;  %v256_v7 = vld [vmem:[%s934_s1 + $0x8] sm:$0xff]  ;;  %563 = vmatprep.subr.mxu1 %v717_v6  ;;  %vm273_vm2 = vcmask 130048   ;;  %vm349_vm3 = vcmask 64512   ;;  %s242_s13 = scalar_lea.vmem [#allocation5], %s540_s25 }
  0x37   : > { %v250_v5 = vadd.f32 %v861_v4, %v859_v2  ;;  %557 = vmatpush3.msra.mxu0 %v256_v7  ;;  %v255_v8 = vld [vmem:[%s934_s1] sm:$0xff]  ;;  %560 = vmatprep.mubr.msk.f32.mxu0 %vm718_vm0, %v717_v6  ;;  %v261_v10 = vand.u32 127, %v260_v9  ;;  %v263_v11 = vshrl.u32 %v260_v9, 7  ;;  %s460_s17 = sshll.u32 %s242_s13, 4  ;;  %s550_s26 = sshll.u32 %s773_s22, 9  ;;  %s883_s17 = int_to_ptr.vmem [resolvable:$true] %s460_s17 }
  0x38   : > { %248 = vadd.xlane.f32.xlu0 %v247_v3  ;;  %558 = vmatprep.subr.mxu0 %v717_v6  ;;  %v347_v22 = vld [vmem:[%s936_s3] sm:$0xff]  ;;  %s888_s14 = scalar_lea.hbm %s938_s5, %s550_s26  ;;  %s447_s22 = scalar_lea.sflag [#allocation4], %s849_s23 }
  0x39   : > { %559 = vmatpush3.msra.mxu0 %v255_v8  ;;  %565 = vmatprep.mubr.msk.f32.mxu1 %vm718_vm0, %v717_v6  ;;  %v266_v12 = vadd.s32 4294967288, %v261_v10  ;;  %v264_v14 = vsub.s32 %v261_v10, %v263_v11  ;;  %v257_v23 = vld [vmem:[%s935_s2] sm:$0x1]  ;;  %v429_v35 = vsub.s32 0, %v263_v11  ;;  %s648_s25 = scalar_lea.vmem %s883_s17, 512  ;;  %p947_p12 = scmp.ne.s32.totalorder %s943_s30, 0 }
  0x3a   : > { %564 = vmatpush3.msra.mxu1 %v347_v22  ;;  %v348_v28 = vld [vmem:[%s937_s4] sm:$0x1]  ;;  %p649_p11 = scmp.ne.s32.totalorder %s883_s17, %s648_s25  ;;  %s719_s29 = smov [#allocation5]  }
  0x3b   : > { %v269_v16 = vsub.s32 %v266_v12, %v263_v11  ;;  %s652_s15 = sshll.u32 %s719_s29, 4  ;;  %s653_s15 = int_to_ptr.vmem [resolvable:$false] %s652_s15 }
  0x3c   : > { %251 = vadd.xlane.f32.xlu0 %v250_v5  ;;  %p650_p13 = pnand %p649_p11, %p947_p12  ;;  %s654_s16 = scalar_lea.vmem %s653_s15, 1024 }
  0x3d   : > { %p655_p5 = scmp.lt.s32.totalorder %s883_s17, %s653_s15  ;;  %p656_p7 = scmp.lt.s32.totalorder %s654_s16, %s648_s25 }
  0x3e   : > { %p651_p4 = pneg %p650_p13 }
  0x3f   : > { %p657_p8 = por %p656_p7, %p655_p5 }
  0x41   : > { %p658_p10 = pnand %p657_p8, %p651_p4 }
  0xc1   : > { %v249_v13 = vpop.xlane.xlu0 %248 }
  0xc2   : > { %v253_v15 = vmul.f32 0.00390625, %v249_v13 }
  0xc4   : > { %v265_v19 = vrot.slane %v253_v15, %v264_v14 }
  0xc5   : > { %v252_v17 = vpop.xlane.xlu0 %251 }
  0xc6   : > { %v254_v18 = vmul.f32 0.00390625, %v252_v17 }
  0xc8   : > { %v270_v20 = vrot.slane %v254_v18, %v269_v16 }
  0xca   : > { %v272_v21 = vsel %vm271_vm1, %v270_v20, %v265_v19 }
  0xcb   : > { %561 = vmatmul.mubr.msk.f32.vlgmr.msra.gmra.mxu0 %vm273_vm2, %v272_v21 }
 0x18b   : > { %v342_v24 = vpop.f32.mrf.mxu0 }
 0x18c   : > { %v343_v25 = vadd.f32 %v342_v24, %v257_v23 }
 0x18d   : > { %v562_v26 = vpop.f32.mrf.mxu0 }
 0x18e   : > { %v346_v27 = vmax.f32 %v343_v25, 0.0 }
 0x190   : > { %566 = vmatmul.mubr.msk.f32.vlgmr.msra.gmra.mxu1 %vm349_vm3, %v346_v27 }
 0x250   : > { %v419_v29 = vpop.f32.mrf.mxu1 }
 0x251   : > { %v420_v30 = vadd.f32 %v419_v29, %v348_v28 }
 0x252   : > { %v567_v31 = vpop.f32.mrf.mxu1 }
 0x253   : > { %v423_v32 = vadd.f32 3.0, %v420_v30 }
 0x255   : > { %v424_v33 = vmax.f32 %v423_v32, 0.0 }
 0x257   : > { %v425_v34 = vmin.f32 %v424_v33, 6.0 }
 0x259   : > { %v426_v36 = vmul.f32 0.16666667, %v425_v34 }
 0x25b   : > { %v430_v37 = vrot.slane %v426_v36, %v429_v35 }
 0x25d   : > { %432 = vbcast.lane.b32.xlu1 %v430_v37, 256 }
 0x261   : > { %436 = vbcast.lane.b32.xlu1 %v430_v37, 264 }
 0x2cf   : > { %v433_v38 = vpop.permute.xlu1 %432 }
 0x2d0   : > { %v438_v39 = vmul.f32 %v433_v38, %v243_v0  ;;  %v439_v40 = vmul.f32 %v433_v38, %v244_v1 }
 0x2d2   : > { %442 = vst [vmem:[%s242_s13] sm:$0xff] %v438_v39  ;;  %443 = vst [vmem:[%s242_s13 + $0x8] sm:$0xff] %v439_v40 }
 0x2d3   : > { %v437_v41 = vpop.permute.xlu1 %436 }
 0x2d4   : > { %v440_v42 = vmul.f32 %v437_v41, %v859_v2  ;;  %v441_v43 = vmul.f32 %v437_v41, %v861_v4 }
 0x2d6   : > { %444 = vst [vmem:[%s242_s13 + $0x10] sm:$0xff] %v440_v42  ;;  %445 = vst [vmem:[%s242_s13 + $0x18] sm:$0xff] %v441_v43 }
 0x2d7   : > { %661 = shalt.err (!%p658_p10)
}
 0x2d8   : > { %s662_s8 = scalar_lea.hbm %s888_s14, 512  ;;  %s666_s10 = scalar_lea.hbm %s938_s5, 1024 }
 0x2d9   : > { %p663_p0 = scmp.ne.s32.totalorder %s888_s14, %s662_s8  ;;  %p667_p1 = scmp.lt.s32.totalorder %s888_s14, %s938_s5 }
 0x2da   : > { %p668_p3 = scmp.lt.s32.totalorder %s666_s10, %s662_s8 }
 0x2db   : > { %p664_p2 = pnand %p663_p0, %p947_p12 }
 0x2dc   : > { %p669_p6 = por %p668_p3, %p667_p1 }
 0x2dd   : > { %p665_p9 = pneg %p664_p2 }
 0x2df   : > { %p670_p11 = pnand %p669_p6, %p665_p9 }
 0x2e1   : > { %673 = shalt.err (!%p670_p11)
}
 0x2e2   : > { %s720_s26 = smov 256   ;;  %s721_s28 = smov 16  }
 0x2e3   : > { %570 = dma.vmem_to_hbm [thread:$0]  (%p947_p12), %s883_s17, 512, %s888_s14, %s447_s22, %s720_s26, %s720_s26, %s721_s28  }
 0x2e4 PF: > { %s475_s12 = sand.u32 1, %s700_s18   ;;  %p948_p13 = scmp.ne.s32.totalorder %s944_s6, 0 }
 0x2e5   : > { %p949_p4 = scmp.ge.s32.totalorder %s712_s21, 2  ;;  %s476_s25 = scalar_lea.sflag [#allocation4], %s475_s12 }
 0x2e7   : > { %p577_p5 = pnand %p949_p4, %p948_p13 }
 0x2e9   : > { %p578_p7 = pneg %p577_p5 }
 0x2eb   : > { %695 = dma.done.wait (%p578_p7), %s476_s25, 512  }
 0x2ec   : > { %697 = vsyncadd (%p578_p7), %s476_s25, 4294966784  ;;  %p18_p8 = scmp.ge.s32.totalorder %s777_s24, 4   ;;  %s950_s18 = smov %s704_s19 }
 0x2ed   : > { %s951_s19 = smov %s708_s20  ;;  %s952_s20 = smov %s789_s27 }
 0x2ee   : > { %s953_s21 = smov %s777_s24  ;;  %20 = sbr.rel (!%p18_p8) target bundleno = 5 (0x5), region = 85 }
 0x2f3   :  { %481 = vsyncpa [#allocation3], 1 }
 0x2f4   :  { %483 = vsyncpa [#allocation3 + $0x1], 1 }
 0x2f5   :  { %484 = vsyncpa [#allocation4], 1 }
 0x2f6   :  { %486 = vsyncpa [#allocation4 + $0x1], 1 }

</bundles_post_ra>
